<compile_context>
chip_gen: v7x
topology: tpu7x:2x2x1
jax: 0.10.0
libtpu: 0.0.40
codegen_flags: <defaults>
</compile_context>

<pallas_src>
import functools
import math

import jax
import jax.numpy as jnp
from jax.experimental import pallas as pl
from jax.experimental.pallas import tpu as pltpu


# ----------------------------------------------------------------------------
# Small shared helpers
# ----------------------------------------------------------------------------
def _elu(x):
    # F.elu (alpha=1); exp only of min(x, 0) so the dead branch cannot overflow.
    return jnp.where(x > 0, x, jnp.exp(jnp.minimum(x, 0.0)) - 1.0)


def _blob_layout(N, nfeat, nhid, nheads, fc_num, nclass):
    """Row offsets of each parameter inside the single packed (rows, cols) blob.
    Every section starts on a sublane-aligned (multiple-of-8) row."""
    a8 = lambda r: -(-r // 8) * 8
    HH = nheads * nhid
    off_w = 0                               # (nfeat, HH)        packed W of all heads
    off_a = off_w + a8(nfeat)               # (HH, 2*nheads)     block-diagonal a of all heads
    off_ow = off_a + a8(HH)                 # (HH, fc_num)       out_att.W
    off_oa = off_ow + a8(HH)                # (fc_num, 2)        out_att.a as [a1|a2]
    off_fc = off_oa + a8(fc_num)            # nclass blocks of (N, fc_num) fc weight
    cstride = a8(N)
    off_fb = off_fc + nclass * cstride      # (1, nclass)        fc bias
    rows = off_fb + a8(1)
    cols = max(HH, fc_num, 2 * nheads, nclass)
    return dict(off_w=off_w, off_a=off_a, off_ow=off_ow, off_oa=off_oa,
                off_fc=off_fc, cstride=cstride, off_fb=off_fb,
                rows=rows, cols=cols, HH=HH)


# ----------------------------------------------------------------------------
# Fused Pallas kernel (one grid step == one graph)
# ----------------------------------------------------------------------------
def _masked_softmax(e, neg_bias):
    """Row-wise softmax(where(adj>0, e, -9e15), dim=1); neg_bias precomputed."""
    masked = e + neg_bias                               # -9e15 absorbs e exactly in f32
    m = jnp.max(masked, axis=1, keepdims=True)
    p = jnp.exp(masked - m)
    # Defensive only: with -9e15 (finite) masking s >= 1 always.
    s = jnp.maximum(jnp.sum(p, axis=1, keepdims=True), 1e-30)
    inv = pl.reciprocal(s, approx=True)                 # EUP slot
    inv = inv * (2.0 - s * inv)                         # one Newton step -> ~exact
    return p * inv


def gat_fused_kernel(x_ref, nb_ref, p_ref, out_ref, *,
                     alpha, N, nhid, nheads, fc_num, nclass, lay):
    bf16 = jnp.bfloat16
    HH = lay["HH"]
    nfeat = x_ref.shape[2]

    x = x_ref[0]                                        # (N, nfeat) f32
    neg_bias = nb_ref[0]                                # (N, N)     f32, 0 / -9e15

    # ---- all heads' node projections: ONE MXU push  x @ [W_0 | ... | W_{H-1}]
    w_all = p_ref[lay["off_w"]:lay["off_w"] + nfeat, 0:HH]
    wh_all = jnp.dot(x.astype(bf16), w_all.astype(bf16),
                     preferred_element_type=jnp.float32)          # (N, HH) f32
    wh_bf = wh_all.astype(bf16)

    # ---- all heads' [f1 | f2]: ONE MXU push against block-diagonal packed a
    a_pack = p_ref[lay["off_a"]:lay["off_a"] + HH, 0:2 * nheads]
    f_all = jnp.dot(wh_bf, a_pack.astype(bf16),
                    preferred_element_type=jnp.float32)           # (N, 2*nheads)

    # ---- per-head attention, accumulated straight into the out-layer input:
    #      h_cat @ W_out == sum_h elu(h'_h) @ W_out[h*nhid:(h+1)*nhid]
    who = jnp.zeros((N, fc_num), jnp.float32)
    for h in range(nheads):                                       # static unroll
        e = f_all[:, 2 * h:2 * h + 1] + jnp.transpose(f_all[:, 2 * h + 1:2 * h + 2])
        e = jnp.where(e > 0, e, alpha * e)                        # LeakyReLU(alpha)
        att = _masked_softmax(e, neg_bias)
        hp = jnp.dot(att.astype(bf16), wh_bf[:, h * nhid:(h + 1) * nhid],
                     preferred_element_type=jnp.float32)          # (N, nhid)
        head = _elu(hp)                                           # concat=True branch
        w_o = p_ref[lay["off_ow"] + h * nhid: lay["off_ow"] + (h + 1) * nhid, 0:fc_num]
        who = who + jnp.dot(head.astype(bf16), w_o.astype(bf16),
                            preferred_element_type=jnp.float32)   # (N, fc_num)

    # ---- out attention layer (concat=False) followed by GAT-level F.elu
    who_bf = who.astype(bf16)
    a_o = p_ref[lay["off_oa"]:lay["off_oa"] + fc_num, 0:2]
    f_o = jnp.dot(who_bf, a_o.astype(bf16), preferred_element_type=jnp.float32)  # (N, 2)
    e = f_o[:, 0:1] + jnp.transpose(f_o[:, 1:2])
    e = jnp.where(e > 0, e, alpha * e)
    att = _masked_softmax(e, neg_bias)
    out_h = _elu(jnp.dot(att.astype(bf16), who_bf,
                         preferred_element_type=jnp.float32))     # (N, fc_num)

    # ---- fc: Linear(fc_num*N -> nclass) on the row-major flattened out_h,
    #      done OFF the MXU: y[c] = b[c] + sum_{i,j} out_h[i,j] * fc_w[c,i*fc_num+j]
    y = p_ref[lay["off_fb"]:lay["off_fb"] + 1, 0:nclass]          # (1, nclass) bias
    cls = jax.lax.broadcasted_iota(jnp.int32, (1, nclass), 1)
    for c in range(nclass):                                       # static unroll
        w_c = p_ref[lay["off_fc"] + c * lay["cstride"]:
                    lay["off_fc"] + c * lay["cstride"] + N, 0:fc_num]   # (N, fc_num)
        r = jnp.sum(jnp.sum(out_h * w_c, axis=1, keepdims=True),
                    axis=0, keepdims=True)                        # (1, 1)
        y = y + jnp.where(cls == c, r, 0.0)

    # ---- log_softmax(dim=1), all f32
    m = jnp.max(y, axis=1, keepdims=True)
    z = y - m
    lse = jnp.log(jnp.sum(jnp.exp(z), axis=1, keepdims=True))
    out_ref[...] = (z - lse).reshape(1, 1, nclass)


# ----------------------------------------------------------------------------
# Wrapper: one pallas_call, batched over B independent graphs (grid=(B,))
# ----------------------------------------------------------------------------
def gat_forward(x, neg_bias, blob, lay, *, alpha, nhid, nheads, fc_num, nclass):
    B, N, nfeat = x.shape
    kernel = functools.partial(gat_fused_kernel, alpha=alpha, N=N, nhid=nhid,
                               nheads=nheads, fc_num=fc_num, nclass=nclass, lay=lay)
    out = pl.pallas_call(
        kernel,
        grid=(B,),
        in_specs=[
            pl.BlockSpec((1, N, nfeat), lambda b: (b, 0, 0)),
            pl.BlockSpec((1, N, N), lambda b: (b, 0, 0)),
            pl.BlockSpec((lay["rows"], lay["cols"]), lambda b: (0, 0)),
        ],
        out_specs=pl.BlockSpec((1, 1, nclass), lambda b: (b, 0, 0)),
        out_shape=jax.ShapeDtypeStruct((B, 1, nclass), jnp.float32),
        compiler_params=pltpu.CompilerParams(dimension_semantics=("parallel",)),
    )(x, neg_bias, blob)
    return out.reshape(B, nclass)


# ----------------------------------------------------------------------------
# Parameter init (xavier_uniform-style, deterministic) + host-side packing
# ----------------------------------------------------------------------------
def xavier_uniform(key, shape, gain=1.414):
    bound = gain * math.sqrt(6.0 / (shape[0] + shape[1]))
    return jax.random.uniform(key, shape, jnp.float32, -bound, bound)


def init_gat_params(key, N, nfeat, nhid, nclass, fc_num, nheads):
    keys = jax.random.split(key, 2 * nheads + 4)
    W = jnp.stack([xavier_uniform(keys[2 * i], (nfeat, nhid)) for i in range(nheads)])
    a = jnp.stack([xavier_uniform(keys[2 * i + 1], (2 * nhid, 1)) for i in range(nheads)])
    out_W = xavier_uniform(keys[2 * nheads], (nhid * nheads, fc_num))
    out_a = xavier_uniform(keys[2 * nheads + 1], (2 * fc_num, 1))
    d_in = fc_num * 5                                    # nn.Linear(fc_num*5, nclass)
    lb = 1.0 / math.sqrt(d_in)
    fc_w = jax.random.uniform(keys[2 * nheads + 2], (nclass, d_in), jnp.float32, -lb, lb)
    fc_b = jax.random.uniform(keys[2 * nheads + 3], (nclass,), jnp.float32, -lb, lb)
    return dict(W=W, a=a, out_W=out_W, out_a=out_a, fc_w=fc_w, fc_b=fc_b)


def pack_params(params, N):
    nheads, nfeat, nhid = params["W"].shape
    fc_num = params["out_W"].shape[1]
    nclass = params["fc_w"].shape[0]
    lay = _blob_layout(N, nfeat, nhid, nheads, fc_num, nclass)
    HH = lay["HH"]
    blob = jnp.zeros((lay["rows"], lay["cols"]), jnp.float32)
    # all heads' W side by side -> (nfeat, HH)
    w_all = jnp.concatenate([params["W"][h] for h in range(nheads)], axis=1)
    blob = blob.at[lay["off_w"]:lay["off_w"] + nfeat, 0:HH].set(w_all)
    # all heads' a, block-diagonal -> (HH, 2*nheads), head h at rows h*nhid, cols 2h:2h+2
    for h in range(nheads):
        a_h = jnp.concatenate([params["a"][h][:nhid], params["a"][h][nhid:]], axis=1)
        blob = blob.at[lay["off_a"] + h * nhid:lay["off_a"] + (h + 1) * nhid,
                       2 * h:2 * h + 2].set(a_h)
    blob = blob.at[lay["off_ow"]:lay["off_ow"] + HH, 0:fc_num].set(params["out_W"])
    out_a2 = jnp.concatenate([params["out_a"][:fc_num], params["out_a"][fc_num:]], axis=1)
    blob = blob.at[lay["off_oa"]:lay["off_oa"] + fc_num, 0:2].set(out_a2)
    # fc weight per class, reshaped (N, fc_num) to contract directly with out_h
    fc_w3 = params["fc_w"].reshape(nclass, N, fc_num)
    for c in range(nclass):
        r0 = lay["off_fc"] + c * lay["cstride"]
        blob = blob.at[r0:r0 + N, 0:fc_num].set(fc_w3[c])
    blob = blob.at[lay["off_fb"], 0:nclass].set(params["fc_b"])
    return blob, lay


# ----------------------------------------------------------------------------
# Pure-JAX reference (eval mode).  Matmul inputs are cast to mm_dtype so the
# check against the bf16-MXU kernel is tight; everything else is f32.
# ----------------------------------------------------------------------------
def gat_reference(params, x, adj, *, alpha, mm_dtype=jnp.bfloat16):
    def mm(a, b):
        return jnp.dot(a.astype(mm_dtype), b.astype(mm_dtype),
                       preferred_element_type=jnp.float32)

    def layer(h, W, a_vec, concat):
        F_out = W.shape[1]
        Wh = mm(h, W)
        a2 = jnp.concatenate([a_vec[:F_out], a_vec[F_out:]], axis=1)   # (F_out, 2)
        f = mm(Wh, a2)
        e = f[:, 0:1] + f[:, 1:2].T
        e = jnp.where(e > 0, e, alpha * e)
        masked = jnp.where(adj > 0, e, -9.0e15)
        att = jax.nn.softmax(masked, axis=1)
        hp = mm(att, Wh)
        return _elu(hp) if concat else hp

    heads = [layer(x, params["W"][h], params["a"][h], True)
             for h in range(params["W"].shape[0])]
    h = jnp.concatenate(heads, axis=1)
    h = _elu(layer(h, params["out_W"], params["out_a"], False))
    h = h.reshape(1, -1)
    y = jnp.dot(h, params["fc_w"].T,
                precision=jax.lax.Precision.HIGHEST) + params["fc_b"][None, :]
    return jax.nn.log_softmax(y, axis=1)


if __name__ == "__main__":
    # Module hyperparameters. N=5 nodes is required: fc expects fc_num*5 inputs.
    N = 5
    nfeat, nhid, nclass, fc_num, nheads = 8, 8, 4, 16, 2
    alpha = 0.2          # dropout inactive in eval mode
    B = 4                # batch of independent graphs, one launch, grid=(B,)

    key = jax.random.PRNGKey(0)
    k_x, k_adj, k_p = jax.random.split(key, 3)

    x = jax.random.normal(k_x, (B, N, nfeat), jnp.float32)
    # random symmetric adjacency with self loops (so every softmax row is nonempty)
    adj_rand = (jax.random.uniform(k_adj, (B, N, N)) > 0.5).astype(jnp.float32)
    adj = jnp.maximum(adj_rand, jnp.transpose(adj_rand, (0, 2, 1)))
    adj = jnp.maximum(adj, jnp.eye(N, dtype=jnp.float32)[None])
    # adjacency mask hoisted out of the kernel's attention heads
    neg_bias = jnp.where(adj > 0, 0.0, -9.0e15).astype(jnp.float32)

    params = init_gat_params(k_p, N, nfeat, nhid, nclass, fc_num, nheads)
    blob, lay = pack_params(params, N)

    out = gat_forward(x, neg_bias, blob, lay, alpha=alpha, nhid=nhid,
                      nheads=nheads, fc_num=fc_num, nclass=nclass)
    jax.block_until_ready(out)
    assert out.shape == (B, nclass)

    ref = jnp.concatenate([gat_reference(params, x[b], adj[b], alpha=alpha)
                           for b in range(B)], axis=0)
    assert jnp.allclose(out, ref, atol=1e-2, rtol=1e-2), (out, ref)

    print("KERNEL_OK")
</pallas_src>

<mosaic_0001>
module attributes {stable_mosaic.version = 11 : i64} {
  func.func @gat_fused_kernel(%arg0: i32, %arg1: memref<1x5x8xf32, #tpu.memory_space<vmem>>, %arg2: memref<1x5x5xf32, #tpu.memory_space<vmem>>, %arg3: memref<96x16xf32, #tpu.memory_space<vmem>>, %arg4: memref<1x1x4xf32, #tpu.memory_space<vmem>>) attributes {dimension_semantics = [#tpu.dimension_semantics<parallel>], iteration_bounds = array<i64: 4>, scalar_prefetch = 0 : i64, scratch_operands = 0 : i64, tpu.core_type = #tpu.core_type<tc>, window_params = [{transform_indices = @transform_0, window_bounds = array<i64: 1, 5, 8>}, {transform_indices = @transform_1, window_bounds = array<i64: 1, 5, 5>}, {pipeline_mode = #tpu.pipeline_mode<synchronous>, transform_indices = @transform_2, window_bounds = array<i64: 96, 16>}, {transform_indices = @transform_3, window_bounds = array<i64: 1, 1, 4>}]} {
    %c0 = arith.constant 0 : index
    %c0_0 = arith.constant 0 : index
    %c0_1 = arith.constant 0 : index
    %0 = vector.load %arg1[%c0, %c0_0, %c0_1] : memref<1x5x8xf32, #tpu.memory_space<vmem>>, vector<1x5x8xf32>
    %1 = vector.shape_cast %0 : vector<1x5x8xf32> to vector<5x8xf32>
    %c0_2 = arith.constant 0 : index
    %c0_3 = arith.constant 0 : index
    %c0_4 = arith.constant 0 : index
    %2 = vector.load %arg2[%c0_2, %c0_3, %c0_4] : memref<1x5x5xf32, #tpu.memory_space<vmem>>, vector<1x5x5xf32>
    %3 = vector.shape_cast %2 : vector<1x5x5xf32> to vector<5x5xf32>
    %c0_5 = arith.constant 0 : index
    %c0_6 = arith.constant 0 : index
    %4 = vector.load %arg3[%c0_5, %c0_6] : memref<96x16xf32, #tpu.memory_space<vmem>>, vector<8x16xf32>
    %5 = arith.truncf %1 : vector<5x8xf32> to vector<5x8xbf16>
    %6 = arith.truncf %4 : vector<8x16xf32> to vector<8x16xbf16>
    %cst = arith.constant dense<0.000000e+00> : vector<5x16xf32>
    %7 = tpu.matmul %5, %6, %cst {dimension_numbers = #tpu.dot_dimension_numbers<[1], [0], [0], [1], [0, 0, 1, 1], [], []>} : vector<5x8xbf16>, vector<8x16xbf16>, vector<5x16xf32> -> vector<5x16xf32>
    %8 = arith.truncf %7 : vector<5x16xf32> to vector<5x16xbf16>
    %c8 = arith.constant 8 : index
    %c0_7 = arith.constant 0 : index
    %9 = vector.load %arg3[%c8, %c0_7] : memref<96x16xf32, #tpu.memory_space<vmem>>, vector<16x4xf32>
    %10 = arith.truncf %9 : vector<16x4xf32> to vector<16x4xbf16>
    %cst_8 = arith.constant dense<0.000000e+00> : vector<5x4xf32>
    %11 = tpu.matmul %8, %10, %cst_8 {dimension_numbers = #tpu.dot_dimension_numbers<[1], [0], [0], [1], [0, 0, 1, 1], [], []>} : vector<5x16xbf16>, vector<16x4xbf16>, vector<5x4xf32> -> vector<5x4xf32>
    %cst_9 = arith.constant 0.000000e+00 : f32
    %12 = vector.broadcast %cst_9 : f32 to vector<5x16xf32>
    %13 = vector.extract_strided_slice %11 {offsets = [0, 0], sizes = [5, 1], strides = [1, 1]} : vector<5x4xf32> to vector<5x1xf32>
    %14 = vector.extract_strided_slice %11 {offsets = [0, 1], sizes = [5, 1], strides = [1, 1]} : vector<5x4xf32> to vector<5x1xf32>
    %15 = tpu.transpose %14, [1, 0] : vector<5x1xf32> -> vector<1x5xf32>
    %16 = vector.broadcast %13 : vector<5x1xf32> to vector<5x5xf32>
    %17 = vector.broadcast %15 : vector<1x5xf32> to vector<5x5xf32>
    %18 = arith.addf %16, %17 : vector<5x5xf32>
    %cst_10 = arith.constant 0.000000e+00 : f32
    %19 = vector.broadcast %cst_10 : f32 to vector<5x5xf32>
    %20 = arith.cmpf ogt, %18, %19 : vector<5x5xf32>
    %cst_11 = arith.constant 2.000000e-01 : f32
    %21 = vector.broadcast %cst_11 : f32 to vector<5x5xf32>
    %22 = arith.mulf %21, %18 : vector<5x5xf32>
    %23 = arith.select %20, %18, %22 : vector<5x5xi1>, vector<5x5xf32>
    %24 = arith.addf %23, %3 : vector<5x5xf32>
    %cst_12 = arith.constant dense<0xFF800000> : vector<5xf32>
    %25 = vector.multi_reduction <maximumf>, %24, %cst_12 [1] : vector<5x5xf32> to vector<5xf32>
    %26 = vector.shape_cast %25 : vector<5xf32> to vector<5x1xf32>
    %27 = vector.broadcast %26 : vector<5x1xf32> to vector<5x5xf32>
    %28 = arith.subf %24, %27 : vector<5x5xf32>
    %29 = math.exp %28 : vector<5x5xf32>
    %cst_13 = arith.constant dense<0.000000e+00> : vector<5xf32>
    %30 = vector.multi_reduction <add>, %29, %cst_13 [1] : vector<5x5xf32> to vector<5xf32>
    %31 = vector.shape_cast %30 : vector<5xf32> to vector<5x1xf32>
    %cst_14 = arith.constant 1.000000e-30 : f32
    %32 = vector.broadcast %cst_14 : f32 to vector<5x1xf32>
    %33 = arith.maximumf %31, %32 : vector<5x1xf32>
    %34 = tpu.reciprocal %33 {approx = true} : vector<5x1xf32> -> vector<5x1xf32>
    %35 = arith.mulf %33, %34 : vector<5x1xf32>
    %cst_15 = arith.constant 2.000000e+00 : f32
    %36 = vector.broadcast %cst_15 : f32 to vector<5x1xf32>
    %37 = arith.subf %36, %35 : vector<5x1xf32>
    %38 = arith.mulf %34, %37 : vector<5x1xf32>
    %39 = vector.broadcast %38 : vector<5x1xf32> to vector<5x5xf32>
    %40 = arith.mulf %29, %39 : vector<5x5xf32>
    %41 = arith.truncf %40 : vector<5x5xf32> to vector<5x5xbf16>
    %42 = vector.extract_strided_slice %8 {offsets = [0, 0], sizes = [5, 8], strides = [1, 1]} : vector<5x16xbf16> to vector<5x8xbf16>
    %cst_16 = arith.constant dense<0.000000e+00> : vector<5x8xf32>
    %43 = tpu.matmul %41, %42, %cst_16 {dimension_numbers = #tpu.dot_dimension_numbers<[1], [0], [0], [1], [0, 0, 1, 1], [], []>} : vector<5x5xbf16>, vector<5x8xbf16>, vector<5x8xf32> -> vector<5x8xf32>
    %cst_17 = arith.constant 0.000000e+00 : f32
    %44 = vector.broadcast %cst_17 : f32 to vector<5x8xf32>
    %45 = arith.cmpf ogt, %43, %44 : vector<5x8xf32>
    %cst_18 = arith.constant 0.000000e+00 : f32
    %46 = vector.broadcast %cst_18 : f32 to vector<5x8xf32>
    %47 = arith.minimumf %43, %46 : vector<5x8xf32>
    %48 = math.exp %47 : vector<5x8xf32>
    %cst_19 = arith.constant 1.000000e+00 : f32
    %49 = vector.broadcast %cst_19 : f32 to vector<5x8xf32>
    %50 = arith.subf %48, %49 : vector<5x8xf32>
    %51 = arith.select %45, %43, %50 : vector<5x8xi1>, vector<5x8xf32>
    %c24 = arith.constant 24 : index
    %c0_20 = arith.constant 0 : index
    %52 = vector.load %arg3[%c24, %c0_20] : memref<96x16xf32, #tpu.memory_space<vmem>>, vector<8x16xf32>
    %53 = arith.truncf %51 : vector<5x8xf32> to vector<5x8xbf16>
    %54 = arith.truncf %52 : vector<8x16xf32> to vector<8x16xbf16>
    %cst_21 = arith.constant dense<0.000000e+00> : vector<5x16xf32>
    %55 = tpu.matmul %53, %54, %cst_21 {dimension_numbers = #tpu.dot_dimension_numbers<[1], [0], [0], [1], [0, 0, 1, 1], [], []>} : vector<5x8xbf16>, vector<8x16xbf16>, vector<5x16xf32> -> vector<5x16xf32>
    %56 = arith.addf %12, %55 : vector<5x16xf32>
    %57 = vector.extract_strided_slice %11 {offsets = [0, 2], sizes = [5, 1], strides = [1, 1]} : vector<5x4xf32> to vector<5x1xf32>
    %58 = vector.extract_strided_slice %11 {offsets = [0, 3], sizes = [5, 1], strides = [1, 1]} : vector<5x4xf32> to vector<5x1xf32>
    %59 = tpu.transpose %58, [1, 0] : vector<5x1xf32> -> vector<1x5xf32>
    %60 = vector.broadcast %57 : vector<5x1xf32> to vector<5x5xf32>
    %61 = vector.broadcast %59 : vector<1x5xf32> to vector<5x5xf32>
    %62 = arith.addf %60, %61 : vector<5x5xf32>
    %cst_22 = arith.constant 0.000000e+00 : f32
    %63 = vector.broadcast %cst_22 : f32 to vector<5x5xf32>
    %64 = arith.cmpf ogt, %62, %63 : vector<5x5xf32>
    %cst_23 = arith.constant 2.000000e-01 : f32
    %65 = vector.broadcast %cst_23 : f32 to vector<5x5xf32>
    %66 = arith.mulf %65, %62 : vector<5x5xf32>
    %67 = arith.select %64, %62, %66 : vector<5x5xi1>, vector<5x5xf32>
    %68 = arith.addf %67, %3 : vector<5x5xf32>
    %cst_24 = arith.constant dense<0xFF800000> : vector<5xf32>
    %69 = vector.multi_reduction <maximumf>, %68, %cst_24 [1] : vector<5x5xf32> to vector<5xf32>
    %70 = vector.shape_cast %69 : vector<5xf32> to vector<5x1xf32>
    %71 = vector.broadcast %70 : vector<5x1xf32> to vector<5x5xf32>
    %72 = arith.subf %68, %71 : vector<5x5xf32>
    %73 = math.exp %72 : vector<5x5xf32>
    %cst_25 = arith.constant dense<0.000000e+00> : vector<5xf32>
    %74 = vector.multi_reduction <add>, %73, %cst_25 [1] : vector<5x5xf32> to vector<5xf32>
    %75 = vector.shape_cast %74 : vector<5xf32> to vector<5x1xf32>
    %cst_26 = arith.constant 1.000000e-30 : f32
    %76 = vector.broadcast %cst_26 : f32 to vector<5x1xf32>
    %77 = arith.maximumf %75, %76 : vector<5x1xf32>
    %78 = tpu.reciprocal %77 {approx = true} : vector<5x1xf32> -> vector<5x1xf32>
    %79 = arith.mulf %77, %78 : vector<5x1xf32>
    %cst_27 = arith.constant 2.000000e+00 : f32
    %80 = vector.broadcast %cst_27 : f32 to vector<5x1xf32>
    %81 = arith.subf %80, %79 : vector<5x1xf32>
    %82 = arith.mulf %78, %81 : vector<5x1xf32>
    %83 = vector.broadcast %82 : vector<5x1xf32> to vector<5x5xf32>
    %84 = arith.mulf %73, %83 : vector<5x5xf32>
    %85 = arith.truncf %84 : vector<5x5xf32> to vector<5x5xbf16>
    %86 = vector.extract_strided_slice %8 {offsets = [0, 8], sizes = [5, 8], strides = [1, 1]} : vector<5x16xbf16> to vector<5x8xbf16>
    %cst_28 = arith.constant dense<0.000000e+00> : vector<5x8xf32>
    %87 = tpu.matmul %85, %86, %cst_28 {dimension_numbers = #tpu.dot_dimension_numbers<[1], [0], [0], [1], [0, 0, 1, 1], [], []>} : vector<5x5xbf16>, vector<5x8xbf16>, vector<5x8xf32> -> vector<5x8xf32>
    %cst_29 = arith.constant 0.000000e+00 : f32
    %88 = vector.broadcast %cst_29 : f32 to vector<5x8xf32>
    %89 = arith.cmpf ogt, %87, %88 : vector<5x8xf32>
    %cst_30 = arith.constant 0.000000e+00 : f32
    %90 = vector.broadcast %cst_30 : f32 to vector<5x8xf32>
    %91 = arith.minimumf %87, %90 : vector<5x8xf32>
    %92 = math.exp %91 : vector<5x8xf32>
    %cst_31 = arith.constant 1.000000e+00 : f32
    %93 = vector.broadcast %cst_31 : f32 to vector<5x8xf32>
    %94 = arith.subf %92, %93 : vector<5x8xf32>
    %95 = arith.select %89, %87, %94 : vector<5x8xi1>, vector<5x8xf32>
    %c32 = arith.constant 32 : index
    %c0_32 = arith.constant 0 : index
    %96 = vector.load %arg3[%c32, %c0_32] : memref<96x16xf32, #tpu.memory_space<vmem>>, vector<8x16xf32>
    %97 = arith.truncf %95 : vector<5x8xf32> to vector<5x8xbf16>
    %98 = arith.truncf %96 : vector<8x16xf32> to vector<8x16xbf16>
    %cst_33 = arith.constant dense<0.000000e+00> : vector<5x16xf32>
    %99 = tpu.matmul %97, %98, %cst_33 {dimension_numbers = #tpu.dot_dimension_numbers<[1], [0], [0], [1], [0, 0, 1, 1], [], []>} : vector<5x8xbf16>, vector<8x16xbf16>, vector<5x16xf32> -> vector<5x16xf32>
    %100 = arith.addf %56, %99 : vector<5x16xf32>
    %101 = arith.truncf %100 : vector<5x16xf32> to vector<5x16xbf16>
    %c40 = arith.constant 40 : index
    %c0_34 = arith.constant 0 : index
    %102 = vector.load %arg3[%c40, %c0_34] : memref<96x16xf32, #tpu.memory_space<vmem>>, vector<16x2xf32>
    %103 = arith.truncf %102 : vector<16x2xf32> to vector<16x2xbf16>
    %cst_35 = arith.constant dense<0.000000e+00> : vector<5x2xf32>
    %104 = tpu.matmul %101, %103, %cst_35 {dimension_numbers = #tpu.dot_dimension_numbers<[1], [0], [0], [1], [0, 0, 1, 1], [], []>} : vector<5x16xbf16>, vector<16x2xbf16>, vector<5x2xf32> -> vector<5x2xf32>
    %105 = vector.extract_strided_slice %104 {offsets = [0, 0], sizes = [5, 1], strides = [1, 1]} : vector<5x2xf32> to vector<5x1xf32>
    %106 = vector.extract_strided_slice %104 {offsets = [0, 1], sizes = [5, 1], strides = [1, 1]} : vector<5x2xf32> to vector<5x1xf32>
    %107 = tpu.transpose %106, [1, 0] : vector<5x1xf32> -> vector<1x5xf32>
    %108 = vector.broadcast %105 : vector<5x1xf32> to vector<5x5xf32>
    %109 = vector.broadcast %107 : vector<1x5xf32> to vector<5x5xf32>
    %110 = arith.addf %108, %109 : vector<5x5xf32>
    %cst_36 = arith.constant 0.000000e+00 : f32
    %111 = vector.broadcast %cst_36 : f32 to vector<5x5xf32>
    %112 = arith.cmpf ogt, %110, %111 : vector<5x5xf32>
    %cst_37 = arith.constant 2.000000e-01 : f32
    %113 = vector.broadcast %cst_37 : f32 to vector<5x5xf32>
    %114 = arith.mulf %113, %110 : vector<5x5xf32>
    %115 = arith.select %112, %110, %114 : vector<5x5xi1>, vector<5x5xf32>
    %116 = arith.addf %115, %3 : vector<5x5xf32>
    %cst_38 = arith.constant dense<0xFF800000> : vector<5xf32>
    %117 = vector.multi_reduction <maximumf>, %116, %cst_38 [1] : vector<5x5xf32> to vector<5xf32>
    %118 = vector.shape_cast %117 : vector<5xf32> to vector<5x1xf32>
    %119 = vector.broadcast %118 : vector<5x1xf32> to vector<5x5xf32>
    %120 = arith.subf %116, %119 : vector<5x5xf32>
    %121 = math.exp %120 : vector<5x5xf32>
    %cst_39 = arith.constant dense<0.000000e+00> : vector<5xf32>
    %122 = vector.multi_reduction <add>, %121, %cst_39 [1] : vector<5x5xf32> to vector<5xf32>
    %123 = vector.shape_cast %122 : vector<5xf32> to vector<5x1xf32>
    %cst_40 = arith.constant 1.000000e-30 : f32
    %124 = vector.broadcast %cst_40 : f32 to vector<5x1xf32>
    %125 = arith.maximumf %123, %124 : vector<5x1xf32>
    %126 = tpu.reciprocal %125 {approx = true} : vector<5x1xf32> -> vector<5x1xf32>
    %127 = arith.mulf %125, %126 : vector<5x1xf32>
    %cst_41 = arith.constant 2.000000e+00 : f32
    %128 = vector.broadcast %cst_41 : f32 to vector<5x1xf32>
    %129 = arith.subf %128, %127 : vector<5x1xf32>
    %130 = arith.mulf %126, %129 : vector<5x1xf32>
    %131 = vector.broadcast %130 : vector<5x1xf32> to vector<5x5xf32>
    %132 = arith.mulf %121, %131 : vector<5x5xf32>
    %133 = arith.truncf %132 : vector<5x5xf32> to vector<5x5xbf16>
    %cst_42 = arith.constant dense<0.000000e+00> : vector<5x16xf32>
    %134 = tpu.matmul %133, %101, %cst_42 {dimension_numbers = #tpu.dot_dimension_numbers<[1], [0], [0], [1], [0, 0, 1, 1], [], []>} : vector<5x5xbf16>, vector<5x16xbf16>, vector<5x16xf32> -> vector<5x16xf32>
    %cst_43 = arith.constant 0.000000e+00 : f32
    %135 = vector.broadcast %cst_43 : f32 to vector<5x16xf32>
    %136 = arith.cmpf ogt, %134, %135 : vector<5x16xf32>
    %cst_44 = arith.constant 0.000000e+00 : f32
    %137 = vector.broadcast %cst_44 : f32 to vector<5x16xf32>
    %138 = arith.minimumf %134, %137 : vector<5x16xf32>
    %139 = math.exp %138 : vector<5x16xf32>
    %cst_45 = arith.constant 1.000000e+00 : f32
    %140 = vector.broadcast %cst_45 : f32 to vector<5x16xf32>
    %141 = arith.subf %139, %140 : vector<5x16xf32>
    %142 = arith.select %136, %134, %141 : vector<5x16xi1>, vector<5x16xf32>
    %c88 = arith.constant 88 : index
    %c0_46 = arith.constant 0 : index
    %143 = vector.load %arg3[%c88, %c0_46] : memref<96x16xf32, #tpu.memory_space<vmem>>, vector<1x4xf32>
    %144 = tpu.iota {dimensions = array<i32: 1>} : vector<1x4xi32>
    %c56 = arith.constant 56 : index
    %c0_47 = arith.constant 0 : index
    %145 = vector.load %arg3[%c56, %c0_47] : memref<96x16xf32, #tpu.memory_space<vmem>>, vector<5x16xf32>
    %146 = arith.mulf %142, %145 : vector<5x16xf32>
    %cst_48 = arith.constant dense<0.000000e+00> : vector<5xf32>
    %147 = vector.multi_reduction <add>, %146, %cst_48 [1] : vector<5x16xf32> to vector<5xf32>
    %148 = vector.shape_cast %147 : vector<5xf32> to vector<5x1xf32>
    %cst_49 = arith.constant dense<0.000000e+00> : vector<1xf32>
    %149 = vector.multi_reduction <add>, %148, %cst_49 [0] : vector<5x1xf32> to vector<1xf32>
    %150 = vector.shape_cast %149 : vector<1xf32> to vector<1x1xf32>
    %c0_i32 = arith.constant 0 : i32
    %151 = vector.broadcast %c0_i32 : i32 to vector<1x4xi32>
    %152 = arith.cmpi eq, %144, %151 : vector<1x4xi32>
    %cst_50 = arith.constant 0.000000e+00 : f32
    %153 = vector.shape_cast %150 : vector<1x1xf32> to vector<1x1xf32>
    %154 = vector.broadcast %153 : vector<1x1xf32> to vector<1x4xf32>
    %155 = vector.broadcast %cst_50 : f32 to vector<1x4xf32>
    %156 = arith.select %152, %154, %155 : vector<1x4xi1>, vector<1x4xf32>
    %157 = arith.addf %143, %156 : vector<1x4xf32>
    %c64 = arith.constant 64 : index
    %c0_51 = arith.constant 0 : index
    %158 = vector.load %arg3[%c64, %c0_51] : memref<96x16xf32, #tpu.memory_space<vmem>>, vector<5x16xf32>
    %159 = arith.mulf %142, %158 : vector<5x16xf32>
    %cst_52 = arith.constant dense<0.000000e+00> : vector<5xf32>
    %160 = vector.multi_reduction <add>, %159, %cst_52 [1] : vector<5x16xf32> to vector<5xf32>
    %161 = vector.shape_cast %160 : vector<5xf32> to vector<5x1xf32>
    %cst_53 = arith.constant dense<0.000000e+00> : vector<1xf32>
    %162 = vector.multi_reduction <add>, %161, %cst_53 [0] : vector<5x1xf32> to vector<1xf32>
    %163 = vector.shape_cast %162 : vector<1xf32> to vector<1x1xf32>
    %c1_i32 = arith.constant 1 : i32
    %164 = vector.broadcast %c1_i32 : i32 to vector<1x4xi32>
    %165 = arith.cmpi eq, %144, %164 : vector<1x4xi32>
    %cst_54 = arith.constant 0.000000e+00 : f32
    %166 = vector.shape_cast %163 : vector<1x1xf32> to vector<1x1xf32>
    %167 = vector.broadcast %166 : vector<1x1xf32> to vector<1x4xf32>
    %168 = vector.broadcast %cst_54 : f32 to vector<1x4xf32>
    %169 = arith.select %165, %167, %168 : vector<1x4xi1>, vector<1x4xf32>
    %170 = arith.addf %157, %169 : vector<1x4xf32>
    %c72 = arith.constant 72 : index
    %c0_55 = arith.constant 0 : index
    %171 = vector.load %arg3[%c72, %c0_55] : memref<96x16xf32, #tpu.memory_space<vmem>>, vector<5x16xf32>
    %172 = arith.mulf %142, %171 : vector<5x16xf32>
    %cst_56 = arith.constant dense<0.000000e+00> : vector<5xf32>
    %173 = vector.multi_reduction <add>, %172, %cst_56 [1] : vector<5x16xf32> to vector<5xf32>
    %174 = vector.shape_cast %173 : vector<5xf32> to vector<5x1xf32>
    %cst_57 = arith.constant dense<0.000000e+00> : vector<1xf32>
    %175 = vector.multi_reduction <add>, %174, %cst_57 [0] : vector<5x1xf32> to vector<1xf32>
    %176 = vector.shape_cast %175 : vector<1xf32> to vector<1x1xf32>
    %c2_i32 = arith.constant 2 : i32
    %177 = vector.broadcast %c2_i32 : i32 to vector<1x4xi32>
    %178 = arith.cmpi eq, %144, %177 : vector<1x4xi32>
    %cst_58 = arith.constant 0.000000e+00 : f32
    %179 = vector.shape_cast %176 : vector<1x1xf32> to vector<1x1xf32>
    %180 = vector.broadcast %179 : vector<1x1xf32> to vector<1x4xf32>
    %181 = vector.broadcast %cst_58 : f32 to vector<1x4xf32>
    %182 = arith.select %178, %180, %181 : vector<1x4xi1>, vector<1x4xf32>
    %183 = arith.addf %170, %182 : vector<1x4xf32>
    %c80 = arith.constant 80 : index
    %c0_59 = arith.constant 0 : index
    %184 = vector.load %arg3[%c80, %c0_59] : memref<96x16xf32, #tpu.memory_space<vmem>>, vector<5x16xf32>
    %185 = arith.mulf %142, %184 : vector<5x16xf32>
    %cst_60 = arith.constant dense<0.000000e+00> : vector<5xf32>
    %186 = vector.multi_reduction <add>, %185, %cst_60 [1] : vector<5x16xf32> to vector<5xf32>
    %187 = vector.shape_cast %186 : vector<5xf32> to vector<5x1xf32>
    %cst_61 = arith.constant dense<0.000000e+00> : vector<1xf32>
    %188 = vector.multi_reduction <add>, %187, %cst_61 [0] : vector<5x1xf32> to vector<1xf32>
    %189 = vector.shape_cast %188 : vector<1xf32> to vector<1x1xf32>
    %c3_i32 = arith.constant 3 : i32
    %190 = vector.broadcast %c3_i32 : i32 to vector<1x4xi32>
    %191 = arith.cmpi eq, %144, %190 : vector<1x4xi32>
    %cst_62 = arith.constant 0.000000e+00 : f32
    %192 = vector.shape_cast %189 : vector<1x1xf32> to vector<1x1xf32>
    %193 = vector.broadcast %192 : vector<1x1xf32> to vector<1x4xf32>
    %194 = vector.broadcast %cst_62 : f32 to vector<1x4xf32>
    %195 = arith.select %191, %193, %194 : vector<1x4xi1>, vector<1x4xf32>
    %196 = arith.addf %183, %195 : vector<1x4xf32>
    %cst_63 = arith.constant dense<0xFF800000> : vector<1xf32>
    %197 = vector.multi_reduction <maximumf>, %196, %cst_63 [1] : vector<1x4xf32> to vector<1xf32>
    %198 = vector.shape_cast %197 : vector<1xf32> to vector<1x1xf32>
    %199 = vector.broadcast %198 : vector<1x1xf32> to vector<1x4xf32>
    %200 = arith.subf %196, %199 : vector<1x4xf32>
    %201 = math.exp %200 : vector<1x4xf32>
    %cst_64 = arith.constant dense<0.000000e+00> : vector<1xf32>
    %202 = vector.multi_reduction <add>, %201, %cst_64 [1] : vector<1x4xf32> to vector<1xf32>
    %203 = vector.shape_cast %202 : vector<1xf32> to vector<1x1xf32>
    %204 = math.log %203 : vector<1x1xf32>
    %205 = vector.broadcast %204 : vector<1x1xf32> to vector<1x4xf32>
    %206 = arith.subf %200, %205 : vector<1x4xf32>
    %207 = vector.shape_cast %206 : vector<1x4xf32> to vector<1x1x4xf32>
    %c0_65 = arith.constant 0 : index
    %c0_66 = arith.constant 0 : index
    %c0_67 = arith.constant 0 : index
    %208 = vector.load %arg4[%c0_65, %c0_66, %c0_67] : memref<1x1x4xf32, #tpu.memory_space<vmem>>, vector<1x1x4xf32>
    tpu.vector_store %arg4[%c0_65, %c0_66, %c0_67], %207 {strides = array<i32>} : memref<1x1x4xf32, #tpu.memory_space<vmem>>, vector<1x1x4xf32>,
    return
  }
  func.func @transform_0(%arg0: i32) -> (i32, i32, i32) {
    %c0_i32 = arith.constant 0 : i32
    %c0_i32_0 = arith.constant 0 : i32
    %c0_i32_1 = arith.constant 0 : i32
    return %arg0, %c0_i32, %c0_i32_0 : i32, i32, i32
  }
  func.func @transform_1(%arg0: i32) -> (i32, i32, i32) {
    %c0_i32 = arith.constant 0 : i32
    %c0_i32_0 = arith.constant 0 : i32
    %c0_i32_1 = arith.constant 0 : i32
    return %arg0, %c0_i32, %c0_i32_0 : i32, i32, i32
  }
  func.func @transform_2(%arg0: i32) -> (i32, i32) {
    %c0_i32 = arith.constant 0 : i32
    %c0_i32_0 = arith.constant 0 : i32
    %c0_i32_1 = arith.constant 0 : i32
    return %c0_i32, %c0_i32_0 : i32, i32
  }
  func.func @transform_3(%arg0: i32) -> (i32, i32, i32) {
    %c0_i32 = arith.constant 0 : i32
    %c0_i32_0 = arith.constant 0 : i32
    %c0_i32_1 = arith.constant 0 : i32
    return %arg0, %c0_i32, %c0_i32_0 : i32, i32, i32
  }
}

</mosaic_0001>

<bundles_post_ra>
// kernel: tpu_custom_call.1
= control target key start
LH: loop header
LB: loop body
LE: loop exit
PB: predicated region body
PF: predicated region fallthrough
CT: control target
= control target key end

     0   :  { %8 = vsyncpa [#allocation3], 0  ;;  %s1411_s0 = inlined_call_operand.vmem [shape: f32[4,5,8], index: 0, kind: input, shape index: {}]   ;;  %s1412_s1 = inlined_call_operand.vmem [shape: f32[4,5,5], index: 1, kind: input, shape index: {}]   ;;  %s1413_s2 = inlined_call_operand.vmem [shape: f32[96,16], index: 2, kind: input, shape index: {}]   ;;  %s1414_s3 = inlined_call_operand.hbm [shape: f32[4,1,4], index: 3, kind: output, shape index: {}]  }
   0x1   :  { %10 = vsyncpa [#allocation3 + $0x1], 0  ;;  %s1198_s12 = smov 0   ;;  %s1200_s13 = smov 0  }
   0x2   :  { %s1202_s14 = smov 0   ;;  %s1204_s15 = smov 0  }
   0x3 LB: > { %s1219_s16 = sadd.s32 4294967295, %s1167_s15   ;;  %s945_s17 = sadd.s32 4294967294, %s1167_s15   ;;  %s1167_s15 = sphi %s1204_s15, %s1420_s15   ;;  %s1163_s14 = sphi %s1202_s14, %s1419_s14   ;;  %s1159_s13 = sphi %s1200_s13, %s1418_s13   ;;  %s1155_s12 = sphi %s1198_s12, %s1417_s12  }
   0x4   : > { %s1223_s18 = sadd.s32 1, %s1167_s15   ;;  %s96_s19 = sadd.s32 1, %s1163_s14 }
   0x5   : > { %s93_s20 = ssub.s32 %s1167_s15, %s1223_s18  ;;  %p106_p0 = scmp.ne.s32.totalorder %s1163_s14, %s1159_s13 }
   0x6   : > { %p94_p1 = scmp.eq.s32.totalorder %s93_s20, 0  ;;  %p107_p2 = scmp.eq.s32.totalorder %s1219_s16, 3 }
   0x7   : > { %p112_p3 = scmp.ne.s32.totalorder %s1159_s13, %s1155_s12  ;;  %p113_p4 = scmp.eq.s32.totalorder %s945_s17, 3 }
   0x8   : > { %s1234_s21 = scalar_select %p94_p1, %s1163_s14, %s96_s19  }
   0x9   : > { %p1236_p5 = por %p107_p2, %p106_p0  ;;  %p1240_p6 = por %p113_p4, %p112_p3 }
   0xa   : > { %p948_p7 = scmp.ge.s32.totalorder %s1167_s15, 1  ;;  %p148_p8 = scmp.lt.s32.totalorder %s1167_s15, 5 }
   0xc   : > { %p149_p9 = pnand %p948_p7, %p148_p8 }
   0xd   : > { %v185_v0 = vld [vmem:[%s1413_s2] sm:$0xff] (!%p149_p9)  ;;  %vm192_vm0 = vcmask (!%p149_p9), 1043456   ;;  %p174_p10 = scmp.lt.s32.totalorder (!%p149_p9), %s1219_s16, 3  ;;  %v1169_v1 = vmov (!%p149_p9), 0.0   ;;  %vm1170_vm1 = vmmov (!%p149_p9), 0   ;;  %vm188_vm2 = vcmask (!%p149_p9), 64512  }
   0xe   : > { %152 = sbr.rel (%p149_p9) target bundleno = 3007 (0xbbf), region = 32  ;;  %981 = vmatprep.subr.bf16.mxu0 (!%p149_p9), %v1169_v1  ;;  %v187_v2 = vpack.c.bf16 (!%p149_p9), %v185_v0, %v185_v0  ;;  %983 = vmatprep.mubr.msk.bf16.mxu0 (!%p149_p9), %vm1170_vm1, %v1169_v1  ;;  %v237_v6 = vld [vmem:[%s1413_s2 + $0x8] sm:$0xff] (!%p149_p9)  ;;  %v238_v7 = vld [vmem:[%s1413_s2 + $0x10] sm:$0xff] (!%p149_p9)  ;;  %v1171_v9 = vmov (!%p149_p9), 2   ;;  %vm354_vm3 = vcmask (!%p149_p9), 1041408   ;;  %vm355_vm4 = vcmask (!%p149_p9), 1042432  }
   0xf   : > { %987 = vmatprep.subr.bf16.mxu1 (!%p149_p9), %v1169_v1  ;;  %989 = vmatprep.mubr.msk.bf16.mxu1 (!%p149_p9), %vm1170_vm1, %v1169_v1  ;;  %v239_v8 = vpack.c.bf16 (!%p149_p9), %v238_v7, %v237_v6  ;;  %v1172_v10 = vmov (!%p149_p9), 65535   ;;  %vm240_vm5 = vcmask (!%p149_p9), 130048   ;;  %s1173_s8 = smov (!%p149_p9), 125   ;;  %v1174_v23 = vmov (!%p149_p9), 0   ;;  %s1175_s9 = smov (!%p149_p9), 127  }
  0x10   : > { %v194_v3 = vsel (!%p149_p9), %vm192_vm0, %v187_v2, 0  ;;  %1080 = vset.pattern.permute.xlu1 (!%p149_p9), %v1171_v9  ;;  %v356_v11 = vsel (!%p149_p9), %vm354_vm3, 4294967295, %v1172_v10  ;;  %v324_v26 = vlaneseq (!%p149_p9)  ;;  %vm333_vm7 = vcmask (!%p149_p9), 36864   ;;  %s1176_s19 = smov (!%p149_p9), 120   ;;  %s172_s20 = sand.u32 (!%p149_p9), 1, %s1159_s13  }
  0x11   : > { %982 = vmatpush3.bf16.msra.mxu0 (!%p149_p9), %v194_v3  ;;  %988 = vmatpush3.bf16.msra.mxu1 (!%p149_p9), %v239_v8  ;;  %v1277_v13 = vsel (!%p149_p9), %vm355_vm4, %v356_v11, 0  ;;  %vm350_vm9 = vcmask (!%p149_p9), 39936   ;;  %v528_v11 = vld [vmem:[%s1413_s2 + $0x20] sm:$0xff] (!%p149_p9)  ;;  %vm791_vm14 = vcmask (!%p149_p9), 126976   ;;  %vm795_vm15 = vcmask (!%p149_p9), 1044480   ;;  %s962_s24 = sshll.u32 (!%p149_p9), %s1219_s16, 4 }
  0x12   : > { %993 = vmatprep.subr.bf16.mxu0 (!%p149_p9), %v1169_v1  ;;  %999 = vmatprep.subr.bf16.mxu1 (!%p149_p9), %v1169_v1  ;;  %v325_v27 = vshrl.u32 (!%p149_p9), %v324_v26, 7  ;;  %vm851_vm4 = vcmask (!%p149_p9), 24576   ;;  %s173_s25 = scalar_lea.vmem (!%p149_p9), [#allocation2], %s172_s20  ;;  %s1368_s29 = scalar_lea.hbm (!%p149_p9), %s1414_s3, %s962_s24 }
  0x14   : > { %v1286_v29 = vsub.s32 (!%p149_p9), 0, %v325_v27 }
  0x15   : > { %s1254_s26 = scalar_select %p174_p10, %s1219_s16, 3 }
  0x16   : > { %s1177_s16 = smov [#allocation2]  }
  0x17   : > { %s949_s27 = sshll.u32 %s1254_s26, 3  ;;  %s878_s26 = sshll.u32 %s173_s25, 4  ;;  %s1370_s26 = int_to_ptr.vmem [resolvable:$true] %s878_s26 }
  0x18   : > { %s177_s30 = scalar_lea.vmem %s1411_s0, %s949_s27  ;;  %s181_s17 = scalar_lea.vmem %s1412_s1, %s949_s27 }
  0x19   : > { %v183_v4 = vld [vmem:[%s177_s30] sm:$0x1f]  ;;  %s866_s30 = scalar_lea.sflag [#allocation3], %s172_s20  ;;  %s1105_s4 = scalar_lea.vmem %s1370_s26, 16 }
  0x1a   : > { %v186_v5 = vpack.c.bf16 %v183_v4, %v183_v4  ;;  %v1295_v37 = vld [vmem:[%s181_s17] sm:$0x1f]  ;;  %p1106_p11 = scmp.ne.s32.totalorder %s1370_s26, %s1105_s4  ;;  %s1109_s5 = sshll.u32 %s1177_s16, 4  ;;  %s1110_s5 = int_to_ptr.vmem [resolvable:$false] %s1109_s5 }
  0x1b   : > { %s1111_s6 = scalar_lea.vmem %s1110_s5, 32  ;;  %p1112_p0 = scmp.lt.s32.totalorder %s1370_s26, %s1110_s5 }
  0x1c   : > { %984 = vmatmul.mubr.msk.bf16.vlgmr.msra.gmra.mrb[0].mxu0 %vm188_vm2, %v186_v5  ;;  %p1107_p12 = pnand %p1106_p11, %p1236_p5  ;;  %p1113_p1 = scmp.lt.s32.totalorder %s1111_s6, %s1105_s4 }
  0x1d   : > { %995 = vmatprep.mubr.msk.bf16.mxu0 %vm1170_vm1, %v1169_v1 }
  0x1e   : > { %p1108_p13 = pneg %p1107_p12  ;;  %p1114_p2 = por %p1113_p1, %p1112_p0 }
  0x20   : > { %p1115_p3 = pnand %p1114_p2, %p1108_p13 }
  0xef   : > { %v230_v12 = vpop.f32.mrb[0].mxu0 }
  0xf0   : > { %v236_v14 = vpack.c.bf16 %v230_v12, %v230_v12  ;;  %v985_v15 = vpop.f32.mrb[1].mxu0  ;;  %v530_v12 = vpack.c.bf16 %v528_v11, %v528_v11 }
  0xf1   : > { %v233_v16 = vpop.f32.mrb[2].mxu0  ;;  %v624_v15 = vld [vmem:[%s1413_s2 + $0x28] sm:$0xff] }
  0xf2   : > { %v358_v17 = vand.u32 %v1277_v13, %v236_v14  ;;  %v986_v18 = vpop.f32.mrb[3].mxu0  ;;  %990 = vmatmul.mubr.msk.bf16.vlgmr.msra.gmra.mrb[0].mxu1 %vm240_vm5, %v236_v14  ;;  %v625_v16 = vld [vmem:[%s1413_s2 + $0x30] sm:$0xff] }
  0xf3   : > { %1001 = vmatprep.mubr.msk.bf16.mxu1 %vm1170_vm1, %v1169_v1 }
  0xf4   : > { %994 = vmatpush3.bf16.msra.mxu0 %v358_v17  ;;  %v626_v17 = vpack.c.bf16 %v625_v16, %v624_v15 }
  0xf5   : > { %1005 = vmatprep.subr.bf16.mxu0 %v1169_v1 }
 0x1c5   : > { %v278_v19 = vpop.f32.mrb[0].mxu1 }
 0x1c6   : > { %445 = vperm.xlu1 %1080, %v278_v19   ;;  %409 = vrot.lane.b32.xlu0 %v278_v19, %s1173_s8  ;;  %v991_v20 = vpop.f32.mrb[1].mxu1 }
 0x1c7   : > { %v281_v21 = vpop.f32.mrb[2].mxu1 }
 0x1c8   : > { %v992_v22 = vpop.f32.mrb[3].mxu1 }
 0x1ca   : > { %1081 = vset.pattern.permute.xlu1 %v1174_v23  ;;  %285 = vrot.lane.b32.xlu0 %v278_v19, %s1175_s9 }
 0x1cb   : > { %321 = vperm.xlu1 %1081, %v278_v19  }
 0x238   : > { %v410_v24 = vpop.permute.xlu0 %409 }
 0x239   : > { %412 = vxpose.xlu0.b32.start.end [1/1] (short) (narrow) %v410_v24, 8 }
 0x23c   : > { %v286_v25 = vpop.permute.xlu0 %285 }
 0x23d   : > { %288 = vxpose.xlu1.b32.start.end [1/1] (short) (narrow) %v286_v25, 8 }
 0x245   : > { %v446_v28 = vpop.permute.xlu1 %445 }
 0x24a   : > { %v322_v30 = vpop.permute.xlu1 %321 }
 0x262   : > { %1082 = vset.pattern.permute.xlu0 %v1174_v23 }
 0x2b9   : > { %v428_v31 = vpop.trf.xlu0 }
 0x2ba   : > { %v451_v32 = vrot.slane %v428_v31, %v1286_v29 }
 0x2bc   : > { %v452_v33 = vadd.f32 %v451_v32, %v446_v28  ;;  %v406_v32 = vld [vmem:[%s1413_s2 + $0x18] sm:$0xff] }
 0x2bd   : > { %v304_v34 = vpop.trf.xlu1 }
 0x2be   : > { %v454_v35 = vmul.f32 0.2, %v452_v33  ;;  %v327_v36 = vrot.slane %v304_v34, %v1286_v29  ;;  %vm453_vm6 = vcmp.gt.f32.partialorder %v452_v33, 0.0  ;;  %v408_v34 = vpack.c.bf16 %v406_v32, %v406_v32 }
 0x2c0   : > { %v328_v38 = vadd.f32 %v327_v36, %v322_v30  ;;  %v455_v39 = vsel %vm453_vm6, %v452_v33, %v454_v35 }
 0x2c1   : > { %v456_v40 = vadd.f32 %v455_v39, %v1295_v37  ;;  %v581_v39 = vsel %vm192_vm0, %v408_v34, 0 }
 0x2c2   : > { %v330_v41 = vmul.f32 0.2, %v328_v38  ;;  %vm329_vm8 = vcmp.gt.f32.partialorder %v328_v38, 0.0 }
 0x2c3   : > { %v457_v42 = vsel %vm333_vm7, %v456_v40, -inf }
 0x2c4   : > { %458 = vmax.xlane.f32.xlu0 %v457_v42  ;;  %v331_v43 = vsel %vm329_vm8, %v328_v38, %v330_v41 }
 0x2c5   : > { %v332_v44 = vadd.f32 %v331_v43, %v1295_v37 }
 0x2c7   : > { %v334_v45 = vsel %vm333_vm7, %v332_v44, -inf }
 0x2c8   : > { %335 = vmax.xlane.f32.xlu1 %v334_v45 }
 0x2d9   : > { %474 = vrot.lane.b32.xlu1 %v236_v14, %s1176_s19  ;;  %v535_v14 = vsel %vm192_vm0, %v530_v12, 0 }
 0x351   : > { %v459_v46 = vpop.xlane.xlu0 %458 }
 0x352   : > { %v460_v47 = vsub.f32 %v456_v40, %v459_v46 }
 0x354   : > { %v461_v48 = vmul.f32 1.442695, %v460_v47 }
 0x355   : > { %v336_v49 = vpop.xlane.xlu1 %335 }
 0x356   : > { %1083 = vpow2.f32 %v461_v48  ;;  %v337_v50 = vsub.f32 %v332_v44, %v336_v49 }
 0x358   : > { %v338_v51 = vmul.f32 1.442695, %v337_v50 }
 0x359   : > { %v475_v52 = vpop.permute.xlu1 %474 }
 0x35a   : > { %1085 = vpow2.f32 %v338_v51  ;;  %v480_v53 = vand.u32 %v475_v52, %v1277_v13 }
 0x35c   : > { %1000 = vmatpush3.bf16.msra.mxu1 %v480_v53 }
 0x35d   : > { %1017 = vmatprep.subr.bf16.mxu1 %v1169_v1 }
 0x360   : > { %v1084_v54 = vpop.eup %1083 }
 0x361   : > { %v463_v55 = vsel %vm333_vm7, %v1084_v54, 0.0 }
 0x362   : > { %464 = vadd.xlane.f32.xlu0 %v463_v55 }
 0x364   : > { %v1086_v56 = vpop.eup %1085 }
 0x365   : > { %v340_v57 = vsel %vm333_vm7, %v1086_v56, 0.0 }
 0x366   : > { %341 = vadd.xlane.f32.xlu0 %v340_v57 }
 0x3ef   : > { %v465_v58 = vpop.xlane.xlu0 %464 }
 0x3f0   : > { %v466_v59 = vmax.f32 %v465_v58, 1e-30 }
 0x3f2   : > { %1087 = vrcp.f32 %v466_v59 }
 0x3f3   : > { %v342_v60 = vpop.xlane.xlu0 %341 }
 0x3f4   : > { %v343_v61 = vmax.f32 %v342_v60, 1e-30 }
 0x3f6   : > { %1089 = vrcp.f32 %v343_v61 }
 0x3fc   : > { %v1088_v62 = vpop.eup %1087 }
 0x3fd   : > { %v468_v63 = vmul.f32 %v1088_v62, %v466_v59 }
 0x3ff   : > { %v469_v0 = vsub.f32 2.0, %v468_v63 }
 0x400   : > { %v1090_v2 = vpop.eup %1089 }
 0x401   : > { %v470_v3 = vmul.f32 %v1088_v62, %v469_v0  ;;  %v345_v4 = vmul.f32 %v1090_v2, %v343_v61 }
 0x403   : > { %v471_v5 = vmul.f32 %v1084_v54, %v470_v3  ;;  %v346_v6 = vsub.f32 2.0, %v345_v4 }
 0x405   : > { %v472_v7 = vpack.c.bf16 %v471_v5, %v471_v5  ;;  %v347_v8 = vmul.f32 %v1090_v2, %v346_v6 }
 0x407   : > { %v348_v9 = vmul.f32 %v1086_v56, %v347_v8  ;;  %1002 = vmatmul.mubr.msk.bf16.vlgmr.msra.gmra.mrb[4].mxu1 %vm350_vm9, %v472_v7 }
 0x408   : > { %1019 = vmatprep.mubr.msk.bf16.mxu1 %vm1170_vm1, %v1169_v1  ;;  %1018 = vmatpush3.bf16.msra.mxu1 %v626_v17 }
 0x409   : > { %v349_v10 = vpack.c.bf16 %v348_v9, %v348_v9  ;;  %1023 = vmatprep.subr.bf16.mxu1 %v1169_v1 }
 0x40b   : > { %996 = vmatmul.mubr.msk.bf16.vlgmr.msra.gmra.mrb[4].mxu0 %vm350_vm9, %v349_v10 }
 0x40c   : > { %1007 = vmatprep.mubr.msk.bf16.mxu0 %vm1170_vm1, %v1169_v1  ;;  %1006 = vmatpush3.bf16.msra.mxu0 %v535_v14 }
 0x40d   : > { %1011 = vmatprep.subr.bf16.mxu0 %v1169_v1 }
 0x4da   : > { %v516_v18 = vpop.f32.mrb[4].mxu1 }
 0x4db   : > { %v523_v19 = vmin.f32 %v516_v18, 0.0  ;;  %v1003_v20 = vpop.f32.mrb[5].mxu1  ;;  %vm522_vm10 = vcmp.gt.f32.partialorder %v516_v18, 0.0 }
 0x4dc   : > { %v519_v21 = vpop.f32.mrb[6].mxu1 }
 0x4dd   : > { %v524_v22 = vmul.f32 1.442695, %v523_v19  ;;  %v1004_v23 = vpop.f32.mrb[7].mxu1  ;;  %v789_v19 = vld [vmem:[%s1413_s2 + $0x38] sm:$0x1f] }
 0x4de   : > { %v394_v24 = vpop.f32.mrb[4].mxu0  ;;  %v821_v21 = vld [vmem:[%s1413_s2 + $0x48] sm:$0x1f] }
 0x4df   : > { %1091 = vpow2.f32 %v524_v22  ;;  %v401_v25 = vmin.f32 %v394_v24, 0.0  ;;  %v997_v27 = vpop.f32.mrb[5].mxu0  ;;  %vm400_vm11 = vcmp.gt.f32.partialorder %v394_v24, 0.0 }
 0x4e0   : > { %v397_v28 = vpop.f32.mrb[6].mxu0 }
 0x4e1   : > { %v402_v30 = vmul.f32 1.442695, %v401_v25  ;;  %v998_v31 = vpop.f32.mrb[7].mxu0  ;;  %v836_v28 = vld [vmem:[%s1413_s2 + $0x50] sm:$0x1f] }
 0x4e3   : > { %1093 = vpow2.f32 %v402_v30 }
 0x4e9   : > { %v1092_v33 = vpop.eup %1091 }
 0x4ea   : > { %v956_v35 = vadd.f32 -1.0, %v1092_v33 }
 0x4ec   : > { %v527_v36 = vsel %vm522_vm10, %v516_v18, %v956_v35  ;;  %v806_v18 = vld [vmem:[%s1413_s2 + $0x40] sm:$0x1f] }
 0x4ed   : > { %v529_v38 = vpack.c.bf16 %v527_v36, %v527_v36  ;;  %v1094_v40 = vpop.eup %1093 }
 0x4ee   : > { %v954_v41 = vadd.f32 -1.0, %v1094_v40 }
 0x4ef   : > { %1008 = vmatmul.mubr.msk.bf16.vlgmr.msra.gmra.mrb[8].mxu0 %vm188_vm2, %v529_v38 }
 0x4f0   : > { %1012 = vmatpush3.bf16.msra.mxu0 %v581_v39  ;;  %1013 = vmatprep.mubr.msk.bf16.mxu0 %vm1170_vm1, %v1169_v1  ;;  %v405_v42 = vsel %vm400_vm11, %v394_v24, %v954_v41 }
 0x4f1   : > { %v407_v43 = vpack.c.bf16 %v405_v42, %v405_v42 }
 0x4fb   : > { %1014 = vmatmul.mubr.msk.bf16.vlgmr.msra.gmra.mrb[8].mxu0 %vm188_vm2, %v407_v43 }
 0x5ce   : > { %v617_v44 = vpop.f32.mrb[8].mxu0 }
 0x5cf   : > { %v623_v45 = vpack.c.bf16 %v617_v44, %v617_v44  ;;  %v1015_v46 = vpop.f32.mrb[9].mxu0 }
 0x5d0   : > { %v620_v47 = vpop.f32.mrb[10].mxu0 }
 0x5d1   : > { %v738_v48 = vand.u32 %v623_v45, %v1277_v13  ;;  %v1016_v49 = vpop.f32.mrb[11].mxu0  ;;  %1020 = vmatmul.mubr.msk.bf16.vlgmr.msra.gmra.mrb[8].mxu1 %vm240_vm5, %v623_v45  ;;  %v788_v47 = vand.u32 127, %v324_v26 }
 0x5d2   : > { %1025 = vmatprep.mubr.msk.bf16.mxu1 %vm1170_vm1, %v1169_v1 }
 0x5d3   : > { %1024 = vmatpush3.bf16.msra.mxu1 %v738_v48  ;;  %vm803_vm0 = vcmp.eq.s32.totalorder %v788_v47, 0  ;;  %vm818_vm1 = vcmp.eq.s32.totalorder %v788_v47, 1  ;;  %vm833_vm2 = vcmp.eq.s32.totalorder %v788_v47, 2  ;;  %vm848_vm3 = vcmp.eq.s32.totalorder %v788_v47, 3 }
 0x6a4   : > { %v664_v50 = vpop.f32.mrb[8].mxu1 }
 0x6a5   : > { %707 = vperm.xlu1 %1081, %v664_v50   ;;  %671 = vrot.lane.b32.xlu0 %v664_v50, %s1175_s9  ;;  %v1021_v51 = vpop.f32.mrb[9].mxu1 }
 0x6a6   : > { %v667_v52 = vpop.f32.mrb[10].mxu1 }
 0x6a7   : > { %v1022_v53 = vpop.f32.mrb[11].mxu1 }
 0x717   : > { %v672_v54 = vpop.permute.xlu0 %671 }
 0x718   : > { %674 = vxpose.xlu1.b32.start.end [1/1] (short) (narrow) %v672_v54, 8 }
 0x724   : > { %v708_v55 = vpop.permute.xlu1 %707 }
 0x798   : > { %v690_v56 = vpop.trf.xlu1 }
 0x799   : > { %v713_v13 = vrot.slane %v690_v56, %v1286_v29 }
 0x79b   : > { %v714_v57 = vadd.f32 %v713_v13, %v708_v55 }
 0x79d   : > { %v716_v58 = vmul.f32 0.2, %v714_v57  ;;  %vm715_vm12 = vcmp.gt.f32.partialorder %v714_v57, 0.0 }
 0x79f   : > { %v717_v59 = vsel %vm715_vm12, %v714_v57, %v716_v58 }
 0x7a0   : > { %v718_v1 = vadd.f32 %v717_v59, %v1295_v37 }
 0x7a2   : > { %v719_v60 = vsel %vm333_vm7, %v718_v1, -inf }
 0x7a3   : > { %720 = vmax.xlane.f32.xlu0 %v719_v60 }
 0x830   : > { %v721_v61 = vpop.xlane.xlu0 %720 }
 0x831   : > { %v722_v62 = vsub.f32 %v718_v1, %v721_v61  ;;  %v786_v1 = vld [vmem:[%s1413_s2 + $0x58] sm:$0x1] }
 0x833   : > { %v723_v63 = vmul.f32 1.442695, %v722_v62 }
 0x835   : > { %1095 = vpow2.f32 %v723_v63 }
 0x83f   : > { %v1096_v0 = vpop.eup %1095 }
 0x840   : > { %v725_v2 = vsel %vm333_vm7, %v1096_v0, 0.0 }
 0x841   : > { %726 = vadd.xlane.f32.xlu0 %v725_v2 }
 0x8ce   : > { %v727_v3 = vpop.xlane.xlu0 %726 }
 0x8cf   : > { %v728_v4 = vmax.f32 %v727_v3, 1e-30 }
 0x8d1   : > { %1097 = vrcp.f32 %v728_v4 }
 0x8db   : > { %v1098_v29 = vpop.eup %1097 }
 0x8dc   : > { %v730_v5 = vmul.f32 %v1098_v29, %v728_v4 }
 0x8de   : > { %v731_v6 = vsub.f32 2.0, %v730_v5 }
 0x8e0   : > { %v732_v7 = vmul.f32 %v1098_v29, %v731_v6 }
 0x8e2   : > { %v733_v8 = vmul.f32 %v1096_v0, %v732_v7 }
 0x8e4   : > { %v734_v37 = vpack.c.bf16 %v733_v8, %v733_v8 }
 0x8e6   : > { %1026 = vmatmul.mubr.msk.bf16.vlgmr.msra.gmra.mrb[12].mxu1 %vm350_vm9, %v734_v37 }
 0x9b9   : > { %v774_v9 = vpop.f32.mrb[12].mxu1 }
 0x9ba   : > { %v781_v10 = vmin.f32 %v774_v9, 0.0  ;;  %v1027_v11 = vpop.f32.mrb[13].mxu1  ;;  %vm780_vm13 = vcmp.gt.f32.partialorder %v774_v9, 0.0 }
 0x9bb   : > { %v777_v12 = vpop.f32.mrb[14].mxu1 }
 0x9bc   : > { %v782_v14 = vmul.f32 1.442695, %v781_v10  ;;  %v1028_v15 = vpop.f32.mrb[15].mxu1 }
 0x9be   : > { %1099 = vpow2.f32 %v782_v14 }
 0x9c8   : > { %v1100_v16 = vpop.eup %1099 }
 0x9c9   : > { %v961_v17 = vadd.f32 -1.0, %v1100_v16 }
 0x9cb   : > { %v785_v20 = vsel %vm780_vm13, %v774_v9, %v961_v17 }
 0x9cc   : > { %v807_v22 = vmul.f32 %v806_v18, %v785_v20  ;;  %v790_v23 = vmul.f32 %v789_v19, %v785_v20  ;;  %v822_v27 = vmul.f32 %v821_v21, %v785_v20  ;;  %v837_v31 = vmul.f32 %v836_v28, %v785_v20 }
 0x9ce   : > { %v808_v24 = vsel %vm791_vm14, %v807_v22, 0.0  ;;  %v792_v25 = vsel %vm791_vm14, %v790_v23, 0.0  ;;  %v823_v30 = vsel %vm791_vm14, %v822_v27, 0.0  ;;  %v838_v32 = vsel %vm791_vm14, %v837_v31, 0.0 }
 0x9cf   : > { %809 = vadd.xlane.f32.xlu1 %v808_v24  ;;  %793 = vadd.xlane.f32.xlu0 %v792_v25 }
 0x9d3   : > { %824 = vadd.xlane.f32.xlu0 %v823_v30 }
 0x9d7   : > { %839 = vadd.xlane.f32.xlu0 %v838_v32 }
 0xa5c   : > { %v810_v33 = vpop.xlane.xlu1 %809  ;;  %v794_v34 = vpop.xlane.xlu0 %793 }
 0xa5d   : > { %v811_v35 = vsel %vm795_vm15, %v810_v33, 0.0  ;;  %v796_v36 = vsel %vm795_vm15, %v794_v34, 0.0 }
 0xa5e   : > { %v812_v38 = vrot.slane %v811_v35, 4  ;;  %v797_v39 = vrot.slane %v796_v36, 4 }
 0xa60   : > { %v813_v40 = vadd.f32 %v812_v38, %v811_v35  ;;  %v798_v41 = vadd.f32 %v797_v39, %v796_v36  ;;  %v825_v42 = vpop.xlane.xlu0 %824 }
 0xa61   : > { %v826_v43 = vsel %vm795_vm15, %v825_v42, 0.0 }
 0xa62   : > { %v814_v44 = vrot.slane %v813_v40, 2  ;;  %v799_v45 = vrot.slane %v798_v41, 2  ;;  %v827_v46 = vrot.slane %v826_v43, 4 }
 0xa64   : > { %v815_v48 = vadd.f32 %v814_v44, %v813_v40  ;;  %v800_v49 = vadd.f32 %v799_v45, %v798_v41  ;;  %v828_v50 = vadd.f32 %v827_v46, %v826_v43  ;;  %v840_v51 = vpop.xlane.xlu0 %839 }
 0xa65   : > { %v841_v52 = vsel %vm795_vm15, %v840_v51, 0.0 }
 0xa66   : > { %v816_v53 = vrot.slane %v815_v48, 1  ;;  %v801_v54 = vrot.slane %v800_v49, 1  ;;  %v829_v55 = vrot.slane %v828_v50, 2  ;;  %v842_v56 = vrot.slane %v841_v52, 4 }
 0xa68   : > { %v817_v13 = vadd.f32 %v816_v53, %v815_v48  ;;  %v802_v57 = vadd.f32 %v801_v54, %v800_v49  ;;  %v830_v58 = vadd.f32 %v829_v55, %v828_v50  ;;  %v843_v59 = vadd.f32 %v842_v56, %v841_v52 }
 0xa6a   : > { %v804_v26 = vsel %vm803_vm0, %v802_v57, 0.0  ;;  %v831_v60 = vrot.slane %v830_v58, 1  ;;  %v844_v61 = vrot.slane %v843_v59, 2  ;;  %v819_v2 = vsel %vm818_vm1, %v817_v13, 0.0 }
 0xa6b   : > { %v805_v62 = vadd.f32 %v804_v26, %v786_v1 }
 0xa6c   : > { %v832_v63 = vadd.f32 %v831_v60, %v830_v58  ;;  %v845_v0 = vadd.f32 %v844_v61, %v843_v59 }
 0xa6d   : > { %v820_v3 = vadd.f32 %v819_v2, %v805_v62 }
 0xa6e   : > { %v846_v4 = vrot.slane %v845_v0, 1  ;;  %v834_v29 = vsel %vm833_vm2, %v832_v63, 0.0 }
 0xa6f   : > { %v835_v6 = vadd.f32 %v834_v29, %v820_v3 }
 0xa70   : > { %v847_v5 = vadd.f32 %v846_v4, %v845_v0 }
 0xa72   : > { %v849_v7 = vsel %vm848_vm3, %v847_v5, 0.0 }
 0xa73   : > { %v850_v8 = vadd.f32 %v849_v7, %v835_v6 }
 0xa75   : > { %v852_v37 = vsel %vm851_vm4, %v850_v8, -inf }
 0xa76   : > { %853 = vmax.xlane.f32.xlu0 %v852_v37 }
 0xb03   : > { %v854_v9 = vpop.xlane.xlu0 %853 }
 0xb04   : > { %v855_v10 = vsub.f32 %v850_v8, %v854_v9 }
 0xb06   : > { %v856_v11 = vmul.f32 1.442695, %v855_v10 }
 0xb08   : > { %1101 = vpow2.f32 %v856_v11 }
 0xb12   : > { %v1102_v12 = vpop.eup %1101 }
 0xb13   : > { %v858_v14 = vsel %vm851_vm4, %v1102_v12, 0.0 }
 0xb14   : > { %859 = vadd.xlane.f32.xlu0 %v858_v14 }
 0xba1   : > { %v860_v15 = vpop.xlane.xlu0 %859 }
 0xba2   : > { %1103 = vlog2.f32 %v860_v15 }
 0xbac   : > { %v1104_v16 = vpop.eup %1103 }
 0xbad   : > { %v862_v17 = vmul.f32 0.6931472, %v1104_v16 }
 0xbaf   : > { %v863_v18 = vsub.f32 %v855_v10, %v862_v17 }
 0xbb1   : > { %864 = vst.msk [vmem:[%s173_s25] sm:$0x1] %vm851_vm4, %v863_v18 }
 0xbb2   : > { %1118 = shalt.err (!%p1115_p3)
}
 0xbb3   : > { %s1119_s7 = scalar_lea.hbm %s1368_s29, 16  ;;  %s1123_s10 = scalar_lea.hbm %s1414_s3, 64 }
 0xbb4   : > { %p1120_p4 = scmp.ne.s32.totalorder %s1368_s29, %s1119_s7  ;;  %p1124_p9 = scmp.lt.u32.totalorder %s1368_s29, %s1414_s3 }
 0xbb5   : > { %p1125_p10 = scmp.lt.u32.totalorder %s1123_s10, %s1119_s7  ;;  %p1127_p12 = scmp.lt.u32.totalorder %s1119_s7, %s1368_s29 }
 0xbb6   : > { %p1121_p7 = pnand %p1120_p4, %p1236_p5 }
 0xbb7   : > { %p1126_p11 = por %p1125_p10, %p1124_p9 }
 0xbb8   : > { %p1122_p8 = pneg %p1121_p7 }
 0xbb9   : > { %p1128_p13 = por %p1127_p12, %p1126_p11 }
 0xbbb   : > { %p1129_p0 = pnand %p1128_p13, %p1122_p8 }
 0xbbd   : > { %1132 = shalt.err (!%p1129_p0)
}
 0xbbe   : > { %1033 = dma.vmem_to_hbm [thread:$0]  (%p1236_p5), %s1370_s26, 16, %s1368_s29, %s866_s30  }
 0xbbf PF: > { %p1039_p1 = scmp.ge.s32.totalorder %s1167_s15, 2  ;;  %s890_s19 = sand.u32 1, %s1155_s12  }
 0xbc0   : > { %s891_s20 = scalar_lea.sflag [#allocation3], %s890_s19 }
 0xbc1   : > { %p1036_p2 = pnand %p1039_p1, %p1240_p6 }
 0xbc3   : > { %1150 = dma.done.wait (!%p1036_p2), %s891_s20, 16  }
 0xbc4   : > { %1152 = vsyncadd (!%p1036_p2), %s891_s20, 4294967280  ;;  %p13_p3 = scmp.ge.s32.totalorder %s1223_s18, 6   ;;  %s1417_s12 = smov %s1159_s13 }
 0xbc5   : > { %s1418_s13 = smov %s1163_s14  ;;  %s1419_s14 = smov %s1234_s21 }
 0xbc6   : > { %s1420_s15 = smov %s1223_s18  ;;  %15 = sbr.rel (!%p13_p3) target bundleno = 3 (0x3), region = 70 }
 0xbcd   :  { %895 = vsyncpa [#allocation3], 1 }
 0xbce   :  { %897 = vsyncpa [#allocation3 + $0x1], 1 }

</bundles_post_ra>
